<compile_context>
chip_gen: v6e
topology: v6e:2x2x1
jax: 0.10.0
libtpu: 0.0.40
codegen_flags: <defaults>
</compile_context>

<pallas_src>
import math
import functools

import jax
import jax.numpy as jnp
from jax.experimental import pallas as pl
from jax.experimental.pallas import tpu as pltpu


# ---------------------------------------------------------------------------
# Deterministic sinusoidal table (parameter setup -> plain JAX, not a kernel).
# ---------------------------------------------------------------------------
def build_pe_table(d_model: int, max_len: int = 5000) -> jnp.ndarray:
    position = jnp.arange(max_len, dtype=jnp.float32)[:, None]            # [max_len, 1]
    div_term = jnp.exp(
        jnp.arange(0, d_model, 2, dtype=jnp.float32) * (-math.log(10000.0) / d_model)
    )                                                                     # [d_model/2]
    angles = position * div_term                                          # [max_len, d_model/2]
    pe = jnp.zeros((max_len, d_model), dtype=jnp.float32)
    pe = pe.at[:, 0::2].set(jnp.sin(angles))
    pe = pe.at[:, 1::2].set(jnp.cos(angles))
    return pe[:, None, :]                                                 # [max_len, 1, d_model]


# ---------------------------------------------------------------------------
# Kernels
# ---------------------------------------------------------------------------
def _pe_add_kernel(x_ref, pe_ref, o_ref):
    # Eval mode / p == 0: plain broadcast add (pe broadcasts over batch axis).
    o_ref[...] = (x_ref[...] + pe_ref[...]).astype(o_ref.dtype)


def _pe_dropout_bits_kernel(x_ref, pe_ref, bits_ref, o_ref, *, threshold, scale):
    # Portable path: uint32 random bits are streamed in; dropout is a pure
    # integer threshold compare (keep-prob = 1 - p) + one scaled select.
    y = x_ref[...] + pe_ref[...]
    keep = bits_ref[...] >= jnp.uint32(threshold)
    o_ref[...] = jnp.where(keep, y * scale, jnp.zeros_like(y)).astype(o_ref.dtype)


def _pe_dropout_hw_kernel(seed_ref, x_ref, pe_ref, o_ref, *, threshold, scale):
    # TPU path: draw bits with the on-chip PRNG (no extra HBM traffic).
    # Per-tile seed words keep the stream deterministic and independent of
    # grid execution order, so "parallel" axes / megacore sharding are safe.
    pltpu.prng_seed(seed_ref[0], pl.program_id(0), pl.program_id(1))
    y = x_ref[...] + pe_ref[...]
    bits = pltpu.bitcast(pltpu.prng_random_bits(y.shape), jnp.uint32)
    keep = bits >= jnp.uint32(threshold)
    o_ref[...] = jnp.where(keep, y * scale, jnp.zeros_like(y)).astype(o_ref.dtype)


# ---------------------------------------------------------------------------
# Tile selection: target ~2 MiB x-blocks (elementwise roofline sweet spot) so
# the BlockSpec pipeline double-buffers and the worst-case VMEM footprint
# (2 * (x + out + bits) + pe) stays under the scoped default on every chip
# (16 MiB v5e, 32 MiB v6e/v7x; v7x physical VMEM is 64 MiB).
# ---------------------------------------------------------------------------
_TARGET_BLOCK_BYTES = 2 << 20  # ~2 MiB per x block


def _largest_divisor_leq(n: int, cap: int) -> int:
    cap = max(1, min(n, cap))
    for t in range(cap, 0, -1):
        if n % t == 0:
            return t
    return 1


def _choose_tiles(S: int, B: int, D: int, itemsize: int,
                  target_bytes: int = _TARGET_BLOCK_BYTES):
    row_bytes = B * D * itemsize  # one (1, B, D) slab of x
    if row_bytes <= target_bytes:
        seq_tile = _largest_divisor_leq(S, max(1, target_bytes // row_bytes))
        batch_tile = B
    else:
        # A single sequence row is already bigger than the target: tile batch.
        seq_tile = 1
        batch_tile = B
        if B % 8 == 0:
            # (8, 128) rule: a partial batch tile sits on the sublane dim of
            # the block, so it must be a multiple of 8 (or the full extent).
            cap8 = max(1, (target_bytes // (D * itemsize)) // 8)
            batch_tile = _largest_divisor_leq(B // 8, cap8) * 8
        # else: cannot legally tile batch; keep full B (rare edge case).
    return seq_tile, batch_tile


# ---------------------------------------------------------------------------
# Wrapper
# ---------------------------------------------------------------------------
def positional_encoding(
    x: jnp.ndarray,
    pe: jnp.ndarray,
    *,
    p: float = 0.1,
    train: bool = True,
    seed: int = 0,
    seq_tile: int | None = None,
    batch_tile: int | None = None,
    use_hw_prng: bool | None = None,
) -> jnp.ndarray:
    """x: [seq_len, batch, d_model]; pe: [max_len, 1, d_model] (sliced to seq_len)."""
    S, B, D = x.shape
    assert 0.0 <= p < 1.0, "dropout prob must be in [0, 1)"

    # dtype-clean: the pe table is moved at x's width (halves pe DMA for bf16).
    pe_s = pe[:S].astype(x.dtype)  # [S, 1, D]

    if seq_tile is None or batch_tile is None:
        st, bt = _choose_tiles(S, B, D, jnp.dtype(x.dtype).itemsize)
        seq_tile = st if seq_tile is None else seq_tile
        batch_tile = bt if batch_tile is None else batch_tile
    assert S % seq_tile == 0 and B % batch_tile == 0

    grid = (S // seq_tile, B // batch_tile)

    # NOTE: index_maps take (*grid_ids, *scalar_prefetch_refs); `*_` absorbs the
    # optional seed ref on the HW-PRNG path.
    x_spec = pl.BlockSpec((seq_tile, batch_tile, D), lambda i, j, *_: (i, j, 0))
    pe_spec = pl.BlockSpec((seq_tile, 1, D), lambda i, j, *_: (i, 0, 0))
    bits_spec = pl.BlockSpec((seq_tile, batch_tile, D), lambda i, j, *_: (i, j, 0))
    o_spec = pl.BlockSpec((seq_tile, batch_tile, D), lambda i, j, *_: (i, j, 0))

    out_shape = jax.ShapeDtypeStruct((S, B, D), x.dtype)
    # Grid points are independent -> "parallel" on both axes (v7x: 2 TCs).
    cparams = pltpu.CompilerParams(dimension_semantics=("parallel", "parallel"))

    dropout_active = bool(train) and p > 0.0
    if not dropout_active:
        # TODO(synk): for inference this is a single elementwise add; letting
        # XLA fuse it into the surrounding graph can beat a standalone call.
        return pl.pallas_call(
            _pe_add_kernel,
            out_shape=out_shape,
            grid_spec=pltpu.PrefetchScalarGridSpec(
                num_scalar_prefetch=0,
                grid=grid,
                in_specs=[x_spec, pe_spec],
                out_specs=o_spec,
            ),
            compiler_params=cparams,
        )(x, pe_s)

    # Drop iff bits < p * 2^32  (keep-prob = 1 - p, quantized to 2^-32).
    threshold = min(int(round(p * float(1 << 32))), (1 << 32) - 1)
    scale = 1.0 / (1.0 - p)

    if use_hw_prng is None:
        # The on-chip PRNG only lowers on real TPU backends (no CPU/interpret
        # lowering for prng_seed), so auto-detect.
        use_hw_prng = jax.default_backend() == "tpu"

    if use_hw_prng:
        kernel = functools.partial(_pe_dropout_hw_kernel,
                                   threshold=threshold, scale=scale)
        seed_arr = jnp.asarray([seed], dtype=jnp.int32)
        return pl.pallas_call(
            kernel,
            out_shape=out_shape,
            grid_spec=pltpu.PrefetchScalarGridSpec(
                num_scalar_prefetch=1,
                grid=grid,
                in_specs=[x_spec, pe_spec],
                out_specs=o_spec,
            ),
            compiler_params=cparams,
        )(seed_arr, x, pe_s)

    # Portable fallback (non-TPU / interpret): random bits come from jax.random
    # and are streamed through the same block pipeline as x.
    bits = jax.random.bits(jax.random.PRNGKey(seed), (S, B, D), dtype=jnp.uint32)
    kernel = functools.partial(_pe_dropout_bits_kernel,
                               threshold=threshold, scale=scale)
    return pl.pallas_call(
        kernel,
        out_shape=out_shape,
        grid_spec=pltpu.PrefetchScalarGridSpec(
            num_scalar_prefetch=0,
            grid=grid,
            in_specs=[x_spec, pe_spec, bits_spec],
            out_specs=o_spec,
        ),
        compiler_params=cparams,
    )(x, pe_s, bits)


if __name__ == "__main__":
    # d_model chosen as a multiple of 128 so the last (lane) dim is dense and
    # stores are unmasked full-width vst.
    seq_len, batch, d_model = 8, 2, 128
    key = jax.random.PRNGKey(0)
    x = jax.random.normal(key, (seq_len, batch, d_model), dtype=jnp.float32)

    pe = build_pe_table(d_model, max_len=5000)
    ref = x + pe[:seq_len].astype(x.dtype)

    # --- Eval mode (dropout is identity): exact reference check. -------------
    out_eval = jax.block_until_ready(positional_encoding(x, pe, p=0.1, train=False))
    assert out_eval.shape == (seq_len, batch, d_model)
    assert jnp.allclose(out_eval, ref, atol=1e-6, rtol=1e-6)

    # --- bf16 eval path (dtype-clean kernel). ---------------------------------
    out_eval_bf16 = jax.block_until_ready(
        positional_encoding(x.astype(jnp.bfloat16), pe, p=0.1, train=False))
    assert out_eval_bf16.dtype == jnp.bfloat16
    assert jnp.allclose(out_eval_bf16.astype(jnp.float32), ref, atol=5e-2, rtol=5e-2)

    # --- Train mode (PE add + inverted dropout, p = 0.1). ---------------------
    p = 0.1
    out_train = jax.block_until_ready(
        positional_encoding(x, pe, p=p, train=True, seed=42))
    assert out_train.shape == (seq_len, batch, d_model)
    # Structural check (holds for both the HW-PRNG and the bits-input paths):
    # surviving elements equal (x + pe) / (1 - p), dropped elements are 0.
    expected_kept = ref * (1.0 / (1.0 - p))
    kept = out_train != 0.0
    assert jnp.allclose(jnp.where(kept, expected_kept, 0.0), out_train,
                        atol=1e-5, rtol=1e-5)
    # Sanity: dropout actually dropped something but kept most elements.
    keep_frac = jnp.mean(kept.astype(jnp.float32))
    assert 0.5 < float(keep_frac) <= 1.0

    print("KERNEL_OK")
</pallas_src>

<mosaic_0001>
module attributes {stable_mosaic.version = 11 : i64} {
  func.func @_pe_add_kernel(%arg0: i32, %arg1: i32, %arg2: memref<8x2x128xf32, #tpu.memory_space<vmem>>, %arg3: memref<8x1x128xf32, #tpu.memory_space<vmem>>, %arg4: memref<8x2x128xf32, #tpu.memory_space<vmem>>) attributes {dimension_semantics = [#tpu.dimension_semantics<parallel>, #tpu.dimension_semantics<parallel>], iteration_bounds = array<i64: 1, 1>, scalar_prefetch = 0 : i64, scratch_operands = 0 : i64, tpu.core_type = #tpu.core_type<tc>, window_params = [{transform_indices = @transform_0, window_bounds = array<i64: 8, 2, 128>}, {transform_indices = @transform_1, window_bounds = array<i64: 8, 1, 128>}, {transform_indices = @transform_2, window_bounds = array<i64: 8, 2, 128>}]} {
    %c0 = arith.constant 0 : index
    %c0_0 = arith.constant 0 : index
    %c0_1 = arith.constant 0 : index
    %0 = vector.load %arg2[%c0, %c0_0, %c0_1] : memref<8x2x128xf32, #tpu.memory_space<vmem>>, vector<8x2x128xf32>
    %c0_2 = arith.constant 0 : index
    %c0_3 = arith.constant 0 : index
    %c0_4 = arith.constant 0 : index
    %1 = vector.load %arg3[%c0_2, %c0_3, %c0_4] : memref<8x1x128xf32, #tpu.memory_space<vmem>>, vector<8x1x128xf32>
    %2 = vector.broadcast %1 : vector<8x1x128xf32> to vector<8x2x128xf32>
    %3 = arith.addf %0, %2 : vector<8x2x128xf32>
    %c0_5 = arith.constant 0 : index
    %c0_6 = arith.constant 0 : index
    %c0_7 = arith.constant 0 : index
    %4 = vector.load %arg4[%c0_5, %c0_6, %c0_7] : memref<8x2x128xf32, #tpu.memory_space<vmem>>, vector<8x2x128xf32>
    tpu.vector_store %arg4[%c0_5, %c0_6, %c0_7], %3 {strides = array<i32>} : memref<8x2x128xf32, #tpu.memory_space<vmem>>, vector<8x2x128xf32>,
    return
  }
  func.func @transform_0(%arg0: i32, %arg1: i32) -> (i32, i32, i32) {
    %c0_i32 = arith.constant 0 : i32
    %c0_i32_0 = arith.constant 0 : i32
    return %arg0, %arg1, %c0_i32 : i32, i32, i32
  }
  func.func @transform_1(%arg0: i32, %arg1: i32) -> (i32, i32, i32) {
    %c0_i32 = arith.constant 0 : i32
    %c0_i32_0 = arith.constant 0 : i32
    %c0_i32_1 = arith.constant 0 : i32
    return %arg0, %c0_i32, %c0_i32_0 : i32, i32, i32
  }
  func.func @transform_2(%arg0: i32, %arg1: i32) -> (i32, i32, i32) {
    %c0_i32 = arith.constant 0 : i32
    %c0_i32_0 = arith.constant 0 : i32
    return %arg0, %arg1, %c0_i32 : i32, i32, i32
  }
}

</mosaic_0001>

<bundles_post_ra>
// kernel: tpu_custom_call.1
= control target key start
LH: loop header
LB: loop body
LE: loop exit
PB: predicated region body
PF: predicated region fallthrough
CT: control target
= control target key end

     0   :  { %7 = vsyncpa [#allocation3], 0  ;;  %s259_s0 = inlined_call_operand.hbm [shape: f32[8,2,128], index: 0, kind: input, shape index: {}]   ;;  %s260_s1 = inlined_call_operand.hbm [shape: f32[8,1,128], index: 1, kind: input, shape index: {}]   ;;  %s261_s2 = inlined_call_operand.hbm [shape: f32[8,2,128], index: 2, kind: output, shape index: {}]  }
   0x1   :  { %8 = vsyncpa [#allocation6], 0 }
   0x2   :  { %9 = vsyncpa [#allocation4], 0  ;;  %s219_s9 = smov [#allocation2]  }
   0x3   :  { %s15_s10 = sshll.u32 %s219_s9, 4  ;;  %s16_s10 = int_to_ptr.vmem [resolvable:$true] %s15_s10 }
   0x4   :  { %s161_s11 = scalar_lea.vmem %s16_s10, 256  ;;  %p166_p1 = scmp.lt.s32.totalorder %s16_s10, %s16_s10 }
   0x5   :  { %p162_p0 = scmp.ne.s32.totalorder %s16_s10, %s161_s11  ;;  %p167_p2 = scmp.lt.s32.totalorder %s161_s11, %s161_s11 }
   0x7   :  { %p168_p3 = por %p167_p2, %p166_p1 }
   0x9   :  { %p169_p4 = pnand %p168_p3, %p162_p0 }
   0xb   :  { %172 = shalt.err (!%p169_p4)
}
   0xc   :  { %s220_s12 = smov 32   ;;  %s221_s13 = smov 2  }
   0xd   :  { %21 = dma.hbm_to_vmem [thread:$0]  %s259_s0, 256, %s16_s10, [#allocation3], %s220_s12, %s220_s12, %s221_s13  }
   0xe   :  { %s222_s16 = smov [#allocation5]  }
   0xf   :  { %s27_s17 = sshll.u32 %s222_s16, 4  ;;  %s28_s17 = int_to_ptr.vmem [resolvable:$true] %s27_s17 }
  0x10   :  { %s181_s18 = scalar_lea.vmem %s28_s17, 128  ;;  %p186_p6 = scmp.lt.s32.totalorder %s28_s17, %s28_s17 }
  0x11   :  { %p182_p5 = scmp.ne.s32.totalorder %s28_s17, %s181_s18  ;;  %p187_p7 = scmp.lt.s32.totalorder %s181_s18, %s181_s18 }
  0x13   :  { %p188_p8 = por %p187_p7, %p186_p6 }
  0x15   :  { %p189_p9 = pnand %p188_p8, %p182_p5 }
  0x17   :  { %192 = shalt.err (!%p189_p9)
}
  0x18   :  { %s223_s19 = smov 16   ;;  %s224_s20 = smov 1  }
  0x19   :  { %33 = dma.hbm_to_vmem [thread:$0]  %s260_s1, 128, %s28_s17, [#allocation6], %s223_s19, %s223_s19, %s224_s20  }
  0x1a   :  { %213 = dma.done.wait [#allocation3], 256  }
  0x1b   :  { %214 = vsyncadd [#allocation3], 4294967040 }
  0x1c   :  { %215 = dma.done.wait [#allocation6], 128  }
  0x1d   :  { %216 = vsyncadd [#allocation6], 4294967168  ;;  %s225_s0 = smov [#allocation7]   ;;  %v40_v0 = vld [vmem:[#allocation2] sm:$0x3] }
  0x1e   :  { %s250_s23 = sshll.u32 %s225_s0, 4  ;;  %v138_v1 = vld [vmem:[#allocation5] ss:$0 sm:$0xff]  ;;  %v41_v2 = vld [vmem:[#allocation2 + $0x2] sm:$0x3]  ;;  %s126_s23 = int_to_ptr.vmem [resolvable:$true] %s250_s23 }
  0x1f   :  { %v104_v3 = vadd.f32 %v138_v1, %v40_v0  ;;  %v139_v4 = vld [vmem:[#allocation5 + $0x1] ss:$0 sm:$0xff]  ;;  %v42_v5 = vld [vmem:[#allocation2 + $0x4] sm:$0x3]  ;;  %v140_v6 = vld [vmem:[#allocation5 + $0x2] ss:$0 sm:$0xff]  ;;  %p198_p11 = scmp.lt.s32.totalorder %s126_s23, %s126_s23 }
  0x20   :  { %v105_v7 = vadd.f32 %v139_v4, %v41_v2  ;;  %v106_v8 = vadd.f32 %v140_v6, %v42_v5  ;;  %v43_v9 = vld [vmem:[#allocation2 + $0x6] sm:$0x3]  ;;  %v141_v10 = vld [vmem:[#allocation5 + $0x3] ss:$0 sm:$0xff]  ;;  %v44_v11 = vld [vmem:[#allocation2 + $0x8] sm:$0x3] }
  0x21   :  { %112 = vst [vmem:[#allocation7] sm:$0x3] %v104_v3  ;;  %v107_v12 = vadd.f32 %v141_v10, %v43_v9  ;;  %v142_v13 = vld [vmem:[#allocation5 + $0x4] ss:$0 sm:$0xff]  ;;  %v45_v14 = vld [vmem:[#allocation2 + $0xa] sm:$0x3] }
  0x22   :  { %v143_v15 = vld [vmem:[#allocation5 + $0x5] ss:$0 sm:$0xff]  ;;  %113 = vst [vmem:[#allocation7 + $0x2] sm:$0x3] %v105_v7  ;;  %114 = vst [vmem:[#allocation7 + $0x4] sm:$0x3] %v106_v8  ;;  %v108_v16 = vadd.f32 %v142_v13, %v44_v11 }
  0x23   :  { %v109_v17 = vadd.f32 %v143_v15, %v45_v14  ;;  %v46_v18 = vld [vmem:[#allocation2 + $0xc] sm:$0x3]  ;;  %v144_v19 = vld [vmem:[#allocation5 + $0x6] ss:$0 sm:$0xff]  ;;  %v47_v20 = vld [vmem:[#allocation2 + $0xe] sm:$0x3] }
  0x24   :  { %115 = vst [vmem:[#allocation7 + $0x6] sm:$0x3] %v107_v12  ;;  %v110_v21 = vadd.f32 %v144_v19, %v46_v18  ;;  %v145_v22 = vld [vmem:[#allocation5 + $0x7] ss:$0 sm:$0xff]  ;;  %116 = vst [vmem:[#allocation7 + $0x8] sm:$0x3] %v108_v16 }
  0x25   :  { %117 = vst [vmem:[#allocation7 + $0xa] sm:$0x3] %v109_v17  ;;  %v111_v23 = vadd.f32 %v145_v22, %v47_v20  ;;  %s193_s1 = scalar_lea.vmem %s126_s23, 256 }
  0x26   :  { %118 = vst [vmem:[#allocation7 + $0xc] sm:$0x3] %v110_v21  ;;  %p194_p10 = scmp.ne.s32.totalorder %s126_s23, %s193_s1  ;;  %p199_p12 = scmp.lt.s32.totalorder %s193_s1, %s193_s1 }
  0x27   :  { %119 = vst [vmem:[#allocation7 + $0xe] sm:$0x3] %v111_v23 }
  0x28   :  { %p200_p13 = por %p199_p12, %p198_p11 }
  0x2a   :  { %p201_p0 = pnand %p200_p13, %p194_p10 }
  0x2c   :  { %204 = shalt.err (!%p201_p0)
}
  0x2d   :  { %131 = dma.vmem_to_hbm [thread:$0]  %s126_s23, 256, %s261_s2, [#allocation4], %s220_s12, %s220_s12, %s221_s13  }
  0x2e   :  { %217 = dma.done.wait [#allocation4], 256  }
  0x2f   :  { %218 = vsyncadd [#allocation4], 4294967040 }
  0x30   :  { %135 = vsyncpa [#allocation3], 1 }
  0x31   :  { %136 = vsyncpa [#allocation6], 1 }
  0x32   :  { %137 = vsyncpa [#allocation4], 1 }

</bundles_post_ra>
